<compile_context>
chip_gen: v6e
topology: v6e:2x2x1
jax: 0.10.0
libtpu: 0.0.40
codegen_flags: <defaults>
</compile_context>

<pallas_src>
import jax
import jax.numpy as jnp
from jax.experimental import pallas as pl
from jax.experimental.pallas import tpu as pltpu

K = 7  # g_decode_kernel_size


def _shifted_conv_kernel(x_ref, ctx_ref, wl_ref, wg_ref, bl_ref, bg_ref, o_ref):
    # x_ref:   (1, C, TT)      f32  current time tile (channels on sublanes, time on lanes)
    # ctx_ref: (1, 1, C, K-1)  f32  causal left context for this tile (zeros on first tile)
    # wl_ref:  (C, K*C)        bf16 linear-half weight, im2col layout (k-major columns)
    # wg_ref:  (C, K*C)        bf16 gate-half weight
    # bl_ref:  (C, 1)          f32  linear-half bias
    # bg_ref:  (C, 1)          f32  gate-half bias
    # o_ref:   (1, C, TT)
    TT = o_ref.shape[2]

    xt = x_ref[0]                                              # (C, TT) f32 (also residual)
    cx = ctx_ref[0, 0]                                         # (C, K-1)
    xw = jnp.concatenate([cx, xt], axis=1).astype(jnp.bfloat16)  # (C, TT + K - 1)

    # im2col: stack the K causal shifts along sublanes -> (K*C, TT); one fused
    # 224-deep (for C=32) MXU contraction per half instead of 7 shallow matmuls.
    im2col = jnp.concatenate([xw[:, k:k + TT] for k in range(K)], axis=0)

    lin = jnp.dot(wl_ref[...], im2col,
                  preferred_element_type=jnp.float32) + bl_ref[...]   # (C, TT) f32
    gate = jnp.dot(wg_ref[...], im2col,
                   preferred_element_type=jnp.float32) + bg_ref[...]  # (C, TT) f32

    o_ref[0] = (lin * jax.nn.sigmoid(gate) + xt).astype(o_ref.dtype)


def _choose_tile_t(T):
    if T <= 512:
        return T                    # whole sequence in one lane-dense block
    for tt in (512, 384, 256, 128):  # multiples of 128 -> unmasked stores
        if T % tt == 0:
            return tt
    return T


def shifted_conv(x, weight, bias, *, tile_t=None):
    """x: (B, C, T) float32 (PyTorch NCW); weight: (2C, C, K); bias: (2C,)."""
    B, C, T = x.shape
    assert weight.shape == (2 * C, C, K) and bias.shape == (2 * C,)

    if tile_t is None:
        tile_t = _choose_tile_t(T)
    nt = T // tile_t

    # Weights in im2col layout: w_im[o, k*C + i] = weight[o, i, k]; split halves, bf16.
    w_im = jnp.transpose(weight, (0, 2, 1)).reshape(2 * C, K * C)
    wl = w_im[:C].astype(jnp.bfloat16)          # linear half   (C, K*C)
    wg = w_im[C:].astype(jnp.bfloat16)          # gate half     (C, K*C)
    bl = bias[:C].reshape(C, 1).astype(jnp.float32)
    bg = bias[C:].reshape(C, 1).astype(jnp.float32)

    # Tiny causal left-context per T-tile (K-1 = 6 time steps); zeros for tile 0.
    if nt > 1:
        idx = (jnp.arange(1, nt) * tile_t)[:, None] + jnp.arange(-(K - 1), 0)[None, :]
        ctx_rest = jnp.transpose(x[:, :, idx], (0, 2, 1, 3))          # (B, nt-1, C, K-1)
        ctx = jnp.concatenate(
            [jnp.zeros((B, 1, C, K - 1), x.dtype), ctx_rest], axis=1)  # (B, nt, C, K-1)
    else:
        ctx = jnp.zeros((B, 1, C, K - 1), x.dtype)

    return pl.pallas_call(
        _shifted_conv_kernel,
        out_shape=jax.ShapeDtypeStruct((B, C, T), x.dtype),
        grid=(B, nt),
        in_specs=[
            pl.BlockSpec((1, C, tile_t), lambda b, t: (b, 0, t)),
            pl.BlockSpec((1, 1, C, K - 1), lambda b, t: (b, t, 0, 0)),
            pl.BlockSpec((C, K * C), lambda b, t: (0, 0)),
            pl.BlockSpec((C, K * C), lambda b, t: (0, 0)),
            pl.BlockSpec((C, 1), lambda b, t: (0, 0)),
            pl.BlockSpec((C, 1), lambda b, t: (0, 0)),
        ],
        out_specs=pl.BlockSpec((1, C, tile_t), lambda b, t: (b, 0, t)),
        compiler_params=pltpu.CompilerParams(
            dimension_semantics=("parallel", "parallel")),
    )(x, ctx, wl, wg, bl, bg)


def _reference(x_nct, weight, bias):
    # Pure-JAX (f32) reference mirroring the PyTorch forward exactly.
    y = jax.lax.conv_general_dilated(
        x_nct, weight, window_strides=(1,), padding=[(K - 1, K - 1)],
        dimension_numbers=("NCH", "OIH", "NCH"))
    y = y + bias[None, :, None]
    y = y[:, :, :-(K - 1)]
    C = x_nct.shape[1]
    return y[:, :C, :] * jax.nn.sigmoid(y[:, C:, :]) + x_nct


if __name__ == "__main__":
    B, C, T = 2, 32, 16  # batch, decode_dim, sequence length

    key = jax.random.PRNGKey(0)
    kx, kw, kb = jax.random.split(key, 3)

    # PyTorch Conv1d default init: U(-1/sqrt(C*K), 1/sqrt(C*K))
    bound = 1.0 / (C * K) ** 0.5
    weight = jax.random.uniform(kw, (2 * C, C, K), jnp.float32, -bound, bound)
    bias = jax.random.uniform(kb, (2 * C,), jnp.float32, -bound, bound)
    x = jax.random.normal(kx, (B, C, T), jnp.float32)

    out = jax.block_until_ready(shifted_conv(x, weight, bias))

    ref = _reference(x, weight, bias)
    assert out.shape == (B, C, T)
    # bf16 MXU operands (f32 accumulate/gate/residual) -> tolerance ~1e-2.
    assert jnp.allclose(out, ref, atol=2e-2, rtol=2e-2), "mismatch vs reference"

    print("KERNEL_OK")
</pallas_src>

<mosaic_0001>
module attributes {stable_mosaic.version = 11 : i64} {
  func.func @_shifted_conv_kernel(%arg0: i32, %arg1: i32, %arg2: memref<1x32x16xf32, #tpu.memory_space<vmem>>, %arg3: memref<1x1x32x6xf32, #tpu.memory_space<vmem>>, %arg4: memref<32x224xbf16, #tpu.memory_space<vmem>>, %arg5: memref<32x224xbf16, #tpu.memory_space<vmem>>, %arg6: memref<32x1xf32, #tpu.memory_space<vmem>>, %arg7: memref<32x1xf32, #tpu.memory_space<vmem>>, %arg8: memref<1x32x16xf32, #tpu.memory_space<vmem>>) attributes {dimension_semantics = [#tpu.dimension_semantics<parallel>, #tpu.dimension_semantics<parallel>], iteration_bounds = array<i64: 2, 1>, scalar_prefetch = 0 : i64, scratch_operands = 0 : i64, tpu.core_type = #tpu.core_type<tc>, window_params = [{transform_indices = @transform_0, window_bounds = array<i64: 1, 32, 16>}, {transform_indices = @transform_1, window_bounds = array<i64: 1, 1, 32, 6>}, {pipeline_mode = #tpu.pipeline_mode<synchronous>, transform_indices = @transform_2, window_bounds = array<i64: 32, 224>}, {pipeline_mode = #tpu.pipeline_mode<synchronous>, transform_indices = @transform_3, window_bounds = array<i64: 32, 224>}, {pipeline_mode = #tpu.pipeline_mode<synchronous>, transform_indices = @transform_4, window_bounds = array<i64: 32, 1>}, {pipeline_mode = #tpu.pipeline_mode<synchronous>, transform_indices = @transform_5, window_bounds = array<i64: 32, 1>}, {transform_indices = @transform_6, window_bounds = array<i64: 1, 32, 16>}]} {
    %c0 = arith.constant 0 : index
    %c0_0 = arith.constant 0 : index
    %c0_1 = arith.constant 0 : index
    %0 = vector.load %arg2[%c0, %c0_0, %c0_1] : memref<1x32x16xf32, #tpu.memory_space<vmem>>, vector<1x32x16xf32>
    %1 = vector.shape_cast %0 : vector<1x32x16xf32> to vector<32x16xf32>
    %c0_2 = arith.constant 0 : index
    %c0_3 = arith.constant 0 : index
    %c0_4 = arith.constant 0 : index
    %c0_5 = arith.constant 0 : index
    %2 = vector.load %arg3[%c0_2, %c0_3, %c0_4, %c0_5] : memref<1x1x32x6xf32, #tpu.memory_space<vmem>>, vector<1x1x32x6xf32>
    %3 = vector.shape_cast %2 : vector<1x1x32x6xf32> to vector<32x6xf32>
    %4 = tpu.concatenate %3, %1 in 1 : vector<32x6xf32>, vector<32x16xf32> -> vector<32x22xf32>
    %5 = arith.truncf %4 : vector<32x22xf32> to vector<32x22xbf16>
    %6 = vector.extract_strided_slice %5 {offsets = [0, 0], sizes = [32, 16], strides = [1, 1]} : vector<32x22xbf16> to vector<32x16xbf16>
    %7 = vector.extract_strided_slice %5 {offsets = [0, 1], sizes = [32, 16], strides = [1, 1]} : vector<32x22xbf16> to vector<32x16xbf16>
    %8 = vector.extract_strided_slice %5 {offsets = [0, 2], sizes = [32, 16], strides = [1, 1]} : vector<32x22xbf16> to vector<32x16xbf16>
    %9 = vector.extract_strided_slice %5 {offsets = [0, 3], sizes = [32, 16], strides = [1, 1]} : vector<32x22xbf16> to vector<32x16xbf16>
    %10 = vector.extract_strided_slice %5 {offsets = [0, 4], sizes = [32, 16], strides = [1, 1]} : vector<32x22xbf16> to vector<32x16xbf16>
    %11 = vector.extract_strided_slice %5 {offsets = [0, 5], sizes = [32, 16], strides = [1, 1]} : vector<32x22xbf16> to vector<32x16xbf16>
    %12 = vector.extract_strided_slice %5 {offsets = [0, 6], sizes = [32, 16], strides = [1, 1]} : vector<32x22xbf16> to vector<32x16xbf16>
    %13 = tpu.concatenate %6, %7, %8, %9, %10, %11, %12 in 0 : vector<32x16xbf16>, vector<32x16xbf16>, vector<32x16xbf16>, vector<32x16xbf16>, vector<32x16xbf16>, vector<32x16xbf16>, vector<32x16xbf16> -> vector<224x16xbf16>
    %c0_6 = arith.constant 0 : index
    %c0_7 = arith.constant 0 : index
    %14 = vector.load %arg4[%c0_6, %c0_7] : memref<32x224xbf16, #tpu.memory_space<vmem>>, vector<32x224xbf16>
    %cst = arith.constant dense<0.000000e+00> : vector<32x16xf32>
    %15 = tpu.matmul %14, %13, %cst {dimension_numbers = #tpu.dot_dimension_numbers<[1], [0], [0], [1], [0, 0, 1, 1], [], []>} : vector<32x224xbf16>, vector<224x16xbf16>, vector<32x16xf32> -> vector<32x16xf32>
    %c0_8 = arith.constant 0 : index
    %c0_9 = arith.constant 0 : index
    %16 = vector.load %arg6[%c0_8, %c0_9] : memref<32x1xf32, #tpu.memory_space<vmem>>, vector<32x1xf32>
    %17 = vector.broadcast %16 : vector<32x1xf32> to vector<32x16xf32>
    %18 = arith.addf %15, %17 : vector<32x16xf32>
    %c0_10 = arith.constant 0 : index
    %c0_11 = arith.constant 0 : index
    %19 = vector.load %arg5[%c0_10, %c0_11] : memref<32x224xbf16, #tpu.memory_space<vmem>>, vector<32x224xbf16>
    %cst_12 = arith.constant dense<0.000000e+00> : vector<32x16xf32>
    %20 = tpu.matmul %19, %13, %cst_12 {dimension_numbers = #tpu.dot_dimension_numbers<[1], [0], [0], [1], [0, 0, 1, 1], [], []>} : vector<32x224xbf16>, vector<224x16xbf16>, vector<32x16xf32> -> vector<32x16xf32>
    %c0_13 = arith.constant 0 : index
    %c0_14 = arith.constant 0 : index
    %21 = vector.load %arg7[%c0_13, %c0_14] : memref<32x1xf32, #tpu.memory_space<vmem>>, vector<32x1xf32>
    %22 = vector.broadcast %21 : vector<32x1xf32> to vector<32x16xf32>
    %23 = arith.addf %20, %22 : vector<32x16xf32>
    %24 = arith.negf %23 : vector<32x16xf32>
    %25 = math.exp %24 : vector<32x16xf32>
    %cst_15 = arith.constant 1.000000e+00 : f32
    %26 = vector.broadcast %cst_15 : f32 to vector<32x16xf32>
    %27 = arith.addf %26, %25 : vector<32x16xf32>
    %28 = arith.divf %26, %27 : vector<32x16xf32>
    %29 = arith.mulf %18, %28 : vector<32x16xf32>
    %30 = arith.addf %29, %1 : vector<32x16xf32>
    %c0_16 = arith.constant 0 : index
    %c0_17 = arith.constant 0 : index
    %c0_18 = arith.constant 0 : index
    %31 = vector.load %arg8[%c0_16, %c0_17, %c0_18] : memref<1x32x16xf32, #tpu.memory_space<vmem>>, vector<1x32x16xf32>
    %32 = vector.shape_cast %31 : vector<1x32x16xf32> to vector<32x16xf32>
    %33 = vector.shape_cast %30 : vector<32x16xf32> to vector<1x32x16xf32>
    tpu.vector_store %arg8[%c0_16, %c0_17, %c0_18], %33 {strides = array<i32>} : memref<1x32x16xf32, #tpu.memory_space<vmem>>, vector<1x32x16xf32>,
    return
  }
  func.func @transform_0(%arg0: i32, %arg1: i32) -> (i32, i32, i32) {
    %c0_i32 = arith.constant 0 : i32
    %c0_i32_0 = arith.constant 0 : i32
    return %arg0, %c0_i32, %arg1 : i32, i32, i32
  }
  func.func @transform_1(%arg0: i32, %arg1: i32) -> (i32, i32, i32, i32) {
    %c0_i32 = arith.constant 0 : i32
    %c0_i32_0 = arith.constant 0 : i32
    %c0_i32_1 = arith.constant 0 : i32
    return %arg0, %arg1, %c0_i32, %c0_i32_0 : i32, i32, i32, i32
  }
  func.func @transform_2(%arg0: i32, %arg1: i32) -> (i32, i32) {
    %c0_i32 = arith.constant 0 : i32
    %c0_i32_0 = arith.constant 0 : i32
    %c0_i32_1 = arith.constant 0 : i32
    return %c0_i32, %c0_i32_0 : i32, i32
  }
  func.func @transform_3(%arg0: i32, %arg1: i32) -> (i32, i32) {
    %c0_i32 = arith.constant 0 : i32
    %c0_i32_0 = arith.constant 0 : i32
    %c0_i32_1 = arith.constant 0 : i32
    return %c0_i32, %c0_i32_0 : i32, i32
  }
  func.func @transform_4(%arg0: i32, %arg1: i32) -> (i32, i32) {
    %c0_i32 = arith.constant 0 : i32
    %c0_i32_0 = arith.constant 0 : i32
    %c0_i32_1 = arith.constant 0 : i32
    return %c0_i32, %c0_i32_0 : i32, i32
  }
  func.func @transform_5(%arg0: i32, %arg1: i32) -> (i32, i32) {
    %c0_i32 = arith.constant 0 : i32
    %c0_i32_0 = arith.constant 0 : i32
    %c0_i32_1 = arith.constant 0 : i32
    return %c0_i32, %c0_i32_0 : i32, i32
  }
  func.func @transform_6(%arg0: i32, %arg1: i32) -> (i32, i32, i32) {
    %c0_i32 = arith.constant 0 : i32
    %c0_i32_0 = arith.constant 0 : i32
    return %arg0, %c0_i32, %arg1 : i32, i32, i32
  }
}

</mosaic_0001>

<bundles_post_ra>
// kernel: tpu_custom_call.1
= control target key start
LH: loop header
LB: loop body
LE: loop exit
PB: predicated region body
PF: predicated region fallthrough
CT: control target
= control target key end

     0   :  { %s902_s21 = smov 0   ;;  %s904_s22 = smov 0   ;;  %s1069_s0 = inlined_call_operand.vmem [shape: f32[2,32,16], index: 0, kind: input, shape index: {}]   ;;  %s1070_s1 = inlined_call_operand.vmem [shape: f32[2,1,32,6], index: 1, kind: input, shape index: {}]   ;;  %s1071_s2 = inlined_call_operand.vmem [shape: bf16[32,224], index: 2, kind: input, shape index: {}]   ;;  %s1072_s3 = inlined_call_operand.vmem [shape: bf16[32,224], index: 3, kind: input, shape index: {}]   ;;  %s1073_s4 = inlined_call_operand.vmem [shape: f32[32,1], index: 4, kind: input, shape index: {}]   ;;  %s1074_s5 = inlined_call_operand.vmem [shape: f32[32,1], index: 5, kind: input, shape index: {}]   ;;  %s1075_s6 = inlined_call_operand.vmem [shape: f32[2,32,16], index: 6, kind: output, shape index: {}]  }
   0x1   :  { %s906_s23 = smov 0  }
   0x2 LB: > { %s28_s24 = sadd.s32 1, %s853_s22  ;;  %p735_p0 = scmp.ge.s32.totalorder %s857_s23, 1  ;;  %s857_s23 = sphi %s906_s23, %s16_s23   ;;  %s853_s22 = sphi %s904_s22, %s1077_s22   ;;  %s849_s21 = sphi %s902_s21, %s1076_s21  }
   0x3   : > { %p30_p1 = scmp.ge.s32.totalorder %s28_s24, 2  ;;  %p247_p2 = scmp.lt.s32.totalorder %s857_s23, 3 }
   0x5   : > { %s1079_s24 = smov (%p30_p1, %s28_s24), 0  ;;  %p248_p3 = pnand %p735_p0, %p247_p2 }
   0x6   : > { %p292_p4 = scmp.lt.s32.totalorder (!%p248_p3), %s849_s21, 1  ;;  %s859_s29 = smov (!%p248_p3), 6  }
   0x7   : > { %251 = sbr.rel (%p248_p3) target bundleno = 552 (0x228), region = 44  ;;  %s861_s9 = smov (!%p248_p3), 125  }
   0x8   : > { %s862_s10 = smov (!%p248_p3), 126   ;;  %s863_s11 = smov (!%p248_p3), 127  }
   0x9   : > { %s864_s12 = smov (!%p248_p3), 122   ;;  %s865_s13 = smov (!%p248_p3), 123  }
   0xa   : > { %s866_s14 = smov (!%p248_p3), 124  }
   0xc   : > { %s1081_s21 = smov (!%p292_p4, %s849_s21), 1  ;;  %v860_v6 = vmov 0   ;;  %vm342_vm0 = vcmask 48128   ;;  %v809_v23 = vld [vmem:[%s1071_s2 + $0x4] ss:$8 sps:$4 sm:$0xff]   ;;  %vm433_vm1 = vcmask 785408  }
   0xd   : > { %s920_s25 = sshll.u32 %s1081_s21, 5  ;;  %440 = vmatprep.subr.bf16.mxu0 %v860_v6  ;;  %541 = vmatprep.subr.bf16.mxu1 %v860_v6  ;;  %v812_v24 = vld [vmem:[%s1072_s3 + $0x4] ss:$8 sps:$4 sm:$0xff]   ;;  %v496_v27 = vld [vmem:[%s1074_s5 + $0x18] sm:$0xff]  ;;  %v495_v28 = vld [vmem:[%s1074_s5 + $0x10] sm:$0xff]  ;;  %vm622_vm2 = vcmask 130048  }
   0xe   : > { %s299_s28 = scalar_lea.vmem %s1069_s0, %s920_s25  ;;  %806 = vset.pattern.permute.xlu1 %v860_v6  ;;  %805 = vset.pattern.permute.xlu0 %v860_v6  ;;  %s308_s8 = scalar_lea.vmem %s1070_s1, %s920_s25  ;;  %v493_v25 = vld [vmem:[%s1074_s5] sm:$0xff]  ;;  %v494_v26 = vld [vmem:[%s1074_s5 + $0x8] sm:$0xff]  ;;  %v394_v31 = vld [vmem:[%s1073_s4 + $0x18] sm:$0xff] }
   0xf   : > { %v926_v0 = vld [vmem:[%s299_s28 + $0x10] sm:$0xff]  ;;  %v928_v1 = vld [vmem:[%s299_s28 + $0x18] sm:$0xff]  ;;  %v930_v2 = vld [vmem:[%s299_s28] sm:$0xff]  ;;  %746 = vmatprep.mubr.msk.bf16.mxu0 %vm433_vm1, %v809_v23  ;;  %752 = vmatprep.mubr.msk.bf16.mxu1 %vm433_vm1, %v812_v24 }
  0x10   : > { %v795_v3 = vpack.i.bf16 %v928_v1, %v926_v0  ;;  %v934_v4 = vld [vmem:[%s299_s28 + $0x8] sm:$0xff]  ;;  %v324_v7 = vld [vmem:[%s308_s8 + $0x10] sm:$0xff]  ;;  %v325_v8 = vld [vmem:[%s308_s8 + $0x18] sm:$0xff] }
  0x11   : > { %v800_v5 = vpack.i.bf16 %v934_v4, %v930_v2  ;;  %v322_v15 = vld [vmem:[%s308_s8] sm:$0xff]  ;;  %v323_v16 = vld [vmem:[%s308_s8 + $0x8] sm:$0xff]  ;;  %v393_v32 = vld [vmem:[%s1073_s4 + $0x10] sm:$0xff] }
  0x12   : > { %796 = vrot.lane.b32.xlu0 %v795_v3, %s859_s29  ;;  %v392_v29 = vld [vmem:[%s1073_s4 + $0x8] sm:$0xff]  ;;  %v391_v30 = vld [vmem:[%s1073_s4] sm:$0xff]  ;;  %v813_v47 = vld [vmem:[%s1071_s2 + $0x14] ss:$8 sps:$4 sm:$0xff]  }
  0x13   : > { %v807_v45 = vld [vmem:[%s1071_s2] ss:$8 sps:$4 sm:$0xff]   ;;  %v815_v48 = vld [vmem:[%s1072_s3 + $0x14] ss:$8 sps:$4 sm:$0xff]   ;;  %v817_v49 = vld [vmem:[%s1071_s2 + $0x10] ss:$8 sps:$4 sm:$0xff]  }
  0x14   : > { %v810_v46 = vld [vmem:[%s1072_s3] ss:$8 sps:$4 sm:$0xff]   ;;  %v818_v50 = vld [vmem:[%s1072_s3 + $0x10] ss:$8 sps:$4 sm:$0xff]  }
  0x16   : > { %801 = vrot.lane.b32.xlu0 %v800_v5, %s859_s29 }
  0x84   : > { %v797_v9 = vpop.permute.xlu0 %796 }
  0x85   : > { %v799_v10 = vunpack.i.h.bf16 %v797_v9  ;;  %v798_v11 = vunpack.i.l.bf16 %v797_v9 }
  0x87   : > { %v346_v12 = vsel %vm342_vm0, %v325_v8, %v799_v10  ;;  %v345_v13 = vsel %vm342_vm0, %v324_v7, %v798_v11 }
  0x88   : > { %v948_v14 = vpack.c.bf16 %v346_v12, %v345_v13  ;;  %v802_v17 = vpop.permute.xlu0 %801 }
  0x89   : > { %v804_v18 = vunpack.i.h.bf16 %v802_v17  ;;  %v803_v19 = vunpack.i.l.bf16 %v802_v17 }
  0x8a   : > { %365 = vrot.lane.b32.xlu1 %v948_v14, %s861_s9  ;;  %359 = vrot.lane.b32.xlu0 %v948_v14, %s862_s10 }
  0x8b   : > { %v344_v20 = vsel %vm342_vm0, %v323_v16, %v804_v18  ;;  %v343_v21 = vsel %vm342_vm0, %v322_v15, %v803_v19 }
  0x8c   : > { %v954_v22 = vpack.c.bf16 %v344_v20, %v343_v21 }
  0x8e   : > { %353 = vrot.lane.b32.xlu0 %v948_v14, %s863_s11  ;;  %363 = vrot.lane.b32.xlu1 %v954_v22, %s861_s9  ;;  %s316_s9 = scalar_lea.vmem %s1075_s6, %s920_s25 }
  0x92   : > { %383 = vrot.lane.b32.xlu0 %v948_v14, %s864_s12  ;;  %357 = vrot.lane.b32.xlu1 %v954_v22, %s862_s10 }
  0x96   : > { %377 = vrot.lane.b32.xlu0 %v948_v14, %s865_s13  ;;  %351 = vrot.lane.b32.xlu1 %v954_v22, %s863_s11 }
  0x9a   : > { %371 = vrot.lane.b32.xlu0 %v948_v14, %s866_s14  ;;  %381 = vrot.lane.b32.xlu1 %v954_v22, %s864_s12 }
  0x9e   : > { %375 = vrot.lane.b32.xlu1 %v954_v22, %s865_s13  ;;  %499 = vperm.xlu0 %805, %v493_v25  }
  0xa2   : > { %369 = vrot.lane.b32.xlu1 %v954_v22, %s866_s14  ;;  %514 = vperm.xlu0 %805, %v496_v27  }
  0xa6   : > { %504 = vperm.xlu1 %806, %v494_v26   ;;  %402 = vperm.xlu0 %805, %v392_v29  }
  0xaa   : > { %509 = vperm.xlu1 %806, %v495_v28   ;;  %412 = vperm.xlu0 %805, %v394_v31  }
  0xae   : > { %397 = vperm.xlu1 %806, %v391_v30  }
  0xb2   : > { %407 = vperm.xlu1 %806, %v393_v32  }
  0xfc   : > { %v366_v33 = vpop.permute.xlu1 %365  ;;  %v360_v35 = vpop.permute.xlu0 %359 }
  0xfd   : > { %441 = vmatpush1.bf16.msra.mxu0 %v366_v33  ;;  %542 = vmatpush1.bf16.msra.mxu1 %v366_v33 }
  0xfe   : > { %442 = vmatprep.subr.bf16.mxu0 %v860_v6  ;;  %543 = vmatprep.subr.bf16.mxu1 %v860_v6 }
 0x100   : > { %v364_v34 = vpop.permute.xlu1 %363  ;;  %v354_v37 = vpop.permute.xlu0 %353 }
 0x101   : > { %443 = vmatpush1.bf16.msra.mxu0 %v364_v34  ;;  %544 = vmatpush1.bf16.msra.mxu1 %v364_v34 }
 0x102   : > { %444 = vmatprep.subr.bf16.mxu0 %v860_v6  ;;  %545 = vmatprep.subr.bf16.mxu1 %v860_v6 }
 0x104   : > { %v358_v36 = vpop.permute.xlu1 %357  ;;  %v384_v39 = vpop.permute.xlu0 %383 }
 0x105   : > { %445 = vmatpush1.bf16.msra.mxu0 %v360_v35  ;;  %546 = vmatpush1.bf16.msra.mxu1 %v360_v35 }
 0x106   : > { %446 = vmatprep.subr.bf16.mxu0 %v860_v6  ;;  %547 = vmatprep.subr.bf16.mxu1 %v860_v6 }
 0x108   : > { %v352_v38 = vpop.permute.xlu1 %351  ;;  %v378_v41 = vpop.permute.xlu0 %377 }
 0x109   : > { %447 = vmatpush1.bf16.msra.mxu0 %v358_v36  ;;  %548 = vmatpush1.bf16.msra.mxu1 %v358_v36 }
 0x10a   : > { %448 = vmatprep.subr.bf16.mxu0 %v860_v6  ;;  %549 = vmatprep.subr.bf16.mxu1 %v860_v6 }
 0x10c   : > { %v382_v40 = vpop.permute.xlu1 %381  ;;  %v372_v43 = vpop.permute.xlu0 %371 }
 0x10d   : > { %449 = vmatpush1.bf16.msra.mxu0 %v354_v37  ;;  %550 = vmatpush1.bf16.msra.mxu1 %v354_v37 }
 0x10e   : > { %450 = vmatprep.subr.bf16.mxu0 %v860_v6  ;;  %551 = vmatprep.subr.bf16.mxu1 %v860_v6 }
 0x110   : > { %v376_v42 = vpop.permute.xlu1 %375 }
 0x111   : > { %451 = vmatpush1.bf16.msra.mxu0 %v352_v38  ;;  %552 = vmatpush1.bf16.msra.mxu1 %v352_v38 }
 0x112   : > { %452 = vmatprep.subr.bf16.mxu0 %v860_v6  ;;  %553 = vmatprep.subr.bf16.mxu1 %v860_v6 }
 0x114   : > { %v370_v44 = vpop.permute.xlu1 %369 }
 0x115   : > { %453 = vmatpush1.bf16.msra.mxu0 %v948_v14  ;;  %554 = vmatpush1.bf16.msra.mxu1 %v948_v14 }
 0x116   : > { %454 = vmatprep.subr.bf16.mxu0 %v860_v6  ;;  %555 = vmatprep.subr.bf16.mxu1 %v860_v6 }
 0x119   : > { %455 = vmatpush1.bf16.msra.mxu0 %v954_v22  ;;  %556 = vmatpush1.bf16.msra.mxu1 %v954_v22  ;;  %v500_v51 = vpop.permute.xlu0 %499 }
 0x11a   : > { %460 = vmatprep.subr.bf16.mxu0 %v860_v6  ;;  %561 = vmatprep.subr.bf16.mxu1 %v860_v6 }
 0x11d   : > { %461 = vmatpush2.bf16.msra.mxu0 %v384_v39  ;;  %562 = vmatpush2.bf16.msra.mxu1 %v384_v39  ;;  %v515_v11 = vpop.permute.xlu0 %514 }
 0x11e   : > { %462 = vmatprep.subr.bf16.mxu0 %v860_v6  ;;  %563 = vmatprep.subr.bf16.mxu1 %v860_v6 }
 0x121   : > { %463 = vmatpush2.bf16.msra.mxu0 %v382_v40  ;;  %564 = vmatpush2.bf16.msra.mxu1 %v382_v40  ;;  %v505_v54 = vpop.permute.xlu1 %504  ;;  %v403_v31 = vpop.permute.xlu0 %402 }
 0x122   : > { %464 = vmatprep.subr.bf16.mxu0 %v860_v6  ;;  %565 = vmatprep.subr.bf16.mxu1 %v860_v6 }
 0x125   : > { %465 = vmatpush2.bf16.msra.mxu0 %v378_v41  ;;  %566 = vmatpush2.bf16.msra.mxu1 %v378_v41  ;;  %v510_v3 = vpop.permute.xlu1 %509  ;;  %v413_v41 = vpop.permute.xlu0 %412 }
 0x126   : > { %466 = vmatprep.subr.bf16.mxu0 %v860_v6  ;;  %567 = vmatprep.subr.bf16.mxu1 %v860_v6 }
 0x129   : > { %467 = vmatpush2.bf16.msra.mxu0 %v376_v42  ;;  %568 = vmatpush2.bf16.msra.mxu1 %v376_v42  ;;  %v398_v27 = vpop.permute.xlu1 %397 }
 0x12a   : > { %468 = vmatprep.subr.bf16.mxu0 %v860_v6  ;;  %569 = vmatprep.subr.bf16.mxu1 %v860_v6 }
 0x12d   : > { %469 = vmatpush2.bf16.msra.mxu0 %v372_v43  ;;  %570 = vmatpush2.bf16.msra.mxu1 %v372_v43  ;;  %v408_v35 = vpop.permute.xlu1 %407 }
 0x12e   : > { %470 = vmatprep.subr.bf16.mxu0 %v860_v6  ;;  %571 = vmatprep.subr.bf16.mxu1 %v860_v6 }
 0x131   : > { %471 = vmatpush2.bf16.msra.mxu0 %v370_v44  ;;  %572 = vmatpush2.bf16.msra.mxu1 %v370_v44 }
 0x134   : > { %473 = vmatmul.mubr.bf16.vlgmr.msra.gmra.mxu0 %v807_v45  ;;  %574 = vmatmul.mubr.bf16.vlgmr.msra.gmra.mxu1 %v810_v46 }
 0x135   : > { %747 = vmatprep.mubr.msk.bf16.mxu0 %vm433_vm1, %v813_v47  ;;  %753 = vmatprep.mubr.msk.bf16.mxu1 %vm433_vm1, %v815_v48 }
 0x13c   : > { %481 = vmatmul.mubr.bf16.gmra.mxu0 %v817_v49  ;;  %582 = vmatmul.mubr.bf16.gmra.mxu1 %v818_v50 }
 0x1f4   : > { %v474_v52 = vpop.f32.mrf.mxu0  ;;  %v575_v53 = vpop.f32.mrf.mxu1 }
 0x1f5   : > { %v576_v55 = vadd.f32 %v575_v53, %v500_v51  ;;  %v475_v28 = vadd.f32 %v474_v52, %v398_v27 }
 0x1f6   : > { %v476_v56 = vpop.f32.mrf.mxu0  ;;  %v577_v57 = vpop.f32.mrf.mxu1 }
 0x1f7   : > { %v754_v58 = vmul.f32 -1.442695, %v576_v55 }
 0x1f8   : > { %v477_v59 = vpop.f32.mrf.mxu0  ;;  %v578_v60 = vpop.f32.mrf.mxu1 }
 0x1f9   : > { %819 = vpow2.f32 %v754_v58  ;;  %v579_v61 = vadd.f32 %v578_v60, %v505_v54  ;;  %v478_v32 = vadd.f32 %v477_v59, %v403_v31 }
 0x1fa   : > { %v479_v62 = vpop.f32.mrf.mxu0  ;;  %v580_v63 = vpop.f32.mrf.mxu1 }
 0x1fb   : > { %v755_v5 = vmul.f32 -1.442695, %v579_v61 }
 0x1fc   : > { %v482_v6 = vpop.f32.mrf.mxu0  ;;  %v583_v7 = vpop.f32.mrf.mxu1 }
 0x1fd   : > { %821 = vpow2.f32 %v755_v5  ;;  %v584_v8 = vadd.f32 %v583_v7, %v510_v3  ;;  %v483_v38 = vadd.f32 %v482_v6, %v408_v35 }
 0x1fe   : > { %v484_v9 = vpop.f32.mrf.mxu0  ;;  %v585_v10 = vpop.f32.mrf.mxu1 }
 0x1ff   : > { %v756_v12 = vmul.f32 -1.442695, %v584_v8 }
 0x200   : > { %v485_v13 = vpop.f32.mrf.mxu0  ;;  %v586_v14 = vpop.f32.mrf.mxu1 }
 0x201   : > { %823 = vpow2.f32 %v756_v12  ;;  %v587_v15 = vadd.f32 %v586_v14, %v515_v11  ;;  %v486_v43 = vadd.f32 %v485_v13, %v413_v41 }
 0x202   : > { %v588_v16 = vpop.f32.mrf.mxu1  ;;  %v487_v17 = vpop.f32.mrf.mxu0 }
 0x203   : > { %v757_v18 = vmul.f32 -1.442695, %v587_v15 }
 0x205   : > { %825 = vpow2.f32 %v757_v18 }
 0x206   : > { %v820_v19 = vpop.eup %819 }
 0x207   : > { %v602_v20 = vadd.f32 1.0, %v820_v19 }
 0x209   : > { %827 = vrcp.f32 %v602_v20 }
 0x20a   : > { %v822_v21 = vpop.eup %821 }
 0x20b   : > { %v603_v22 = vadd.f32 1.0, %v822_v21 }
 0x20d   : > { %829 = vrcp.f32 %v603_v22 }
 0x20e   : > { %v824_v23 = vpop.eup %823 }
 0x20f   : > { %v604_v24 = vadd.f32 1.0, %v824_v23 }
 0x211   : > { %831 = vrcp.f32 %v604_v24 }
 0x212   : > { %v826_v25 = vpop.eup %825 }
 0x213   : > { %v605_v26 = vadd.f32 1.0, %v826_v25 }
 0x215   : > { %833 = vrcp.f32 %v605_v26 }
 0x216   : > { %v828_v29 = vpop.eup %827 }
 0x217   : > { %v614_v30 = vmul.f32 %v828_v29, %v475_v28 }
 0x219   : > { %v618_v33 = vadd.f32 %v614_v30, %v930_v2 }
 0x21a   : > { %v830_v34 = vpop.eup %829 }
 0x21b   : > { %v615_v36 = vmul.f32 %v830_v34, %v478_v32  ;;  %623 = vst.msk [vmem:[%s316_s9] sm:$0xff] %vm622_vm2, %v618_v33 }
 0x21d   : > { %v619_v37 = vadd.f32 %v615_v36, %v934_v4 }
 0x21e   : > { %v832_v39 = vpop.eup %831 }
 0x21f   : > { %624 = vst.msk [vmem:[%s316_s9 + $0x8] sm:$0xff] %vm622_vm2, %v619_v37  ;;  %v616_v40 = vmul.f32 %v832_v39, %v483_v38 }
 0x221   : > { %v620_v42 = vadd.f32 %v616_v40, %v926_v0 }
 0x222   : > { %v834_v44 = vpop.eup %833 }
 0x223   : > { %625 = vst.msk [vmem:[%s316_s9 + $0x10] sm:$0xff] %vm622_vm2, %v620_v42  ;;  %v617_v2 = vmul.f32 %v834_v44, %v486_v43 }
 0x225   : > { %v621_v45 = vadd.f32 %v617_v2, %v928_v1 }
 0x227   : > { %626 = vst.msk [vmem:[%s316_s9 + $0x18] sm:$0xff] %vm622_vm2, %v621_v45 }
 0x228 PF: > { %s16_s23 = sadd.s32 1, %s857_s23   ;;  %s1076_s21 = smov %s853_s22 }
 0x229   : > { %p13_p5 = scmp.ge.s32.totalorder %s16_s23, 4   ;;  %s1077_s22 = smov %s1079_s24 }
 0x22b   :  { %15 = sbr.rel (!%p13_p5) target bundleno = 2 (0x2), region = 77 }

</bundles_post_ra>
